<compile_context>
chip_gen: v6e
topology: v6e:2x2x1
jax: 0.10.0
libtpu: 0.0.40
codegen_flags: <defaults>
</compile_context>

<pallas_src>
import functools
import math

import jax
import jax.numpy as jnp
from jax.experimental import pallas as pl
from jax.experimental.pallas import tpu as pltpu


def timestep_embedder_kernel(t_ref, freqs_ref, w1_ref, b1_ref, w2_ref, b2_ref,
                             out_ref, *, fuse_k):
    # t_ref:     (TILE_N, 1)      f32
    # freqs_ref: (1, half)        f32
    # w1_ref:    (2*half, H)      f32 or bf16 (MXU operand dtype)
    # b1_ref:    (1, H)           f32
    # w2_ref:    (H, H)           f32 or bf16
    # b2_ref:    (1, H)           f32
    # out_ref:   (TILE_N, H)
    half = freqs_ref.shape[-1]
    cdtype = w1_ref.dtype                # MXU operand dtype

    # --- sinusoidal embedding (elementwise math stays f32 on VPU/EUP) ---
    t = t_ref[...]                       # (TILE_N, 1)
    freqs = freqs_ref[...]               # (1, half)
    args = t * freqs                     # (TILE_N, half) broadcast outer product
    cos_a = jnp.cos(args)
    sin_a = jnp.sin(args)

    # --- MLP: Linear -> SiLU -> Linear ---
    if fuse_k:
        # v6e/v7x: 256-deep MXU -> one K=2*half dot.  half is a multiple of 128
        # here, so the concat lands on a lane boundary (vreg placement only).
        emb = jnp.concatenate([cos_a, sin_a], axis=-1).astype(cdtype)
        h = jnp.dot(emb, w1_ref[...], preferred_element_type=jnp.float32)
    else:
        # v5e and older: 128-deep MXU -> two K=half dots into one f32 acc,
        # avoiding any lane-axis concatenate.  Static sublane-aligned slices.
        h = (jnp.dot(cos_a.astype(cdtype), w1_ref[:half, :],
                     preferred_element_type=jnp.float32)
             + jnp.dot(sin_a.astype(cdtype), w1_ref[half:, :],
                       preferred_element_type=jnp.float32))
    h = h + b1_ref[...]

    # SiLU in f32: exp on the EUP + approximate reciprocal on the EUP slot
    # (keeps the VALU free; hides under the MXU work).
    h = h * pl.reciprocal(1.0 + jnp.exp(-h), approx=True)

    out = jnp.dot(h.astype(cdtype), w2_ref[...],
                  preferred_element_type=jnp.float32) + b2_ref[...]
    out_ref[...] = out.astype(out_ref.dtype)


def _chip_generation():
    """Best-effort TPU generation from the device kind string."""
    try:
        kind = jax.devices()[0].device_kind.lower()
    except Exception:  # no device info -> assume modern
        return 6
    for gen in (7, 6, 5, 4, 3, 2):
        if f"v{gen}" in kind:
            return gen
    return 6


def timestep_embedder(t, freqs, w1, b1, w2, b2, *, tile_n=None,
                      mxu_dtype=jnp.bfloat16, out_dtype=jnp.float32):
    """t: (N,) float.  Returns (N, hidden_size) in out_dtype.

    mxu_dtype: dtype of the matmul operands (weights cast once here; bf16 by
    default since the kernel is weight-DMA bound at small/medium batch).
    """
    n = t.shape[0]
    two_half, hidden = w1.shape
    assert two_half % 2 == 0, "odd frequency_embedding_size not supported"
    half = two_half // 2
    assert freqs.shape == (1, half)
    assert w2.shape == (hidden, hidden)

    gen = _chip_generation()
    # K-fusion only pays on the 256-deep MXUs (v6e/v7x) and only when the
    # concat boundary is lane-aligned.
    fuse_k = (gen >= 6) and (half % 128 == 0)
    # Scoped-VMEM budget: 16 MiB default on v5e and older, 32 MiB on v6e/v7x.
    vmem_budget = (16 << 20) if gen <= 5 else (32 << 20)

    t2d = t.astype(jnp.float32).reshape(n, 1)
    freqs = freqs.astype(jnp.float32)
    w1c = w1.astype(mxu_dtype)
    w2c = w2.astype(mxu_dtype)
    b1_2d = b1.astype(jnp.float32).reshape(1, hidden)
    b2_2d = b2.astype(jnp.float32).reshape(1, hidden)

    w_item = jnp.dtype(mxu_dtype).itemsize
    out_item = jnp.dtype(out_dtype).itemsize

    cost = pl.CostEstimate(
        flops=int(2 * n * (two_half * hidden + hidden * hidden)),
        # cos + sin per freq element, exp + reciprocal per hidden element.
        transcendentals=int(n * (two_half + 2 * hidden)),
        bytes_accessed=int(t2d.nbytes + freqs.nbytes + w1c.nbytes + w2c.nbytes
                           + b1_2d.nbytes + b2_2d.nbytes
                           + n * hidden * out_item),
    )

    def run(single_buffer_invariants):
        buf_mult = 1 if single_buffer_invariants else 2
        # Resident (grid-invariant) footprint.
        resident = buf_mult * ((w1c.size + w2c.size) * w_item
                               + (freqs.size + 2 * hidden) * 4)
        # Per-batch-row cost: double-buffered t/out tiles + live f32
        # intermediates (cos, sin, h, acc).
        per_row = 2 * (4 + hidden * out_item) + 4 * (2 * half + 3 * hidden)
        fit_rows = max(8, int((vmem_budget - resident - (2 << 20)) // per_row))

        if tile_n is not None:
            tn = min(tile_n, n, max(8, fit_rows))
        else:
            # Small batches: one tile (grid=1) so v7x megacore doesn't
            # duplicate the dominant weight DMA across the two TensorCores.
            tn = n if n <= fit_rows else min(512, fit_rows)
        tn = min(tn, n)
        if tn < n:
            tn = max(8, (tn // 8) * 8)
        grid = (pl.cdiv(n, tn),)

        row = lambda i: (i, 0)     # batch-tiled t and output
        const = lambda i: (0, 0)   # freqs / weights / biases: resident in VMEM

        def const_spec(shape):
            if single_buffer_invariants:
                return pl.BlockSpec(shape, const, pipeline_mode=pl.Buffered(1))
            return pl.BlockSpec(shape, const)

        return pl.pallas_call(
            functools.partial(timestep_embedder_kernel, fuse_k=fuse_k),
            out_shape=jax.ShapeDtypeStruct((n, hidden), out_dtype),
            grid_spec=pltpu.PrefetchScalarGridSpec(
                num_scalar_prefetch=0,
                grid=grid,
                in_specs=[
                    pl.BlockSpec((tn, 1), row),
                    const_spec((1, half)),
                    const_spec((two_half, hidden)),
                    const_spec((1, hidden)),
                    const_spec((hidden, hidden)),
                    const_spec((1, hidden)),
                ],
                out_specs=pl.BlockSpec((tn, hidden), row),
            ),
            compiler_params=pltpu.CompilerParams(
                # Batch tiles are independent; harmless on single-TC chips.
                dimension_semantics=("parallel",),
            ),
            cost_estimate=cost,
        )(t2d, freqs, w1c, b1_2d, w2c, b2_2d)

    try:
        # Preferred: single-buffer the grid-invariant operands (halves the
        # resident weight footprint in VMEM).
        return run(True)
    except Exception:
        # Fallback for JAX builds without Buffered(1) support on BlockSpec.
        return run(False)


def make_params(key, hidden_size, frequency_embedding_size):
    """Deterministic synthetic parameters (shapes match the PyTorch module)."""
    k1, k2, k3, k4 = jax.random.split(key, 4)
    # Stored as (in, out): PyTorch weight is (out, in); y = x @ W.T == x @ W_here.
    w1 = jax.random.normal(k1, (frequency_embedding_size, hidden_size),
                           jnp.float32) * 0.02
    b1 = jax.random.normal(k2, (hidden_size,), jnp.float32) * 0.02
    w2 = jax.random.normal(k3, (hidden_size, hidden_size), jnp.float32) * 0.02
    b2 = jax.random.normal(k4, (hidden_size,), jnp.float32) * 0.02
    return w1, b1, w2, b2


def make_freqs(frequency_embedding_size, max_period=10000):
    half = frequency_embedding_size // 2
    freqs = jnp.exp(
        -math.log(max_period) * jnp.arange(half, dtype=jnp.float32) / half)
    return freqs.reshape(1, half)


def reference(t, freqs, w1, b1, w2, b2):
    """Pure-JAX reference of the PyTorch forward pass (f32)."""
    args = t.astype(jnp.float32)[:, None] * freqs  # (N, half)
    emb = jnp.concatenate([jnp.cos(args), jnp.sin(args)], axis=-1)
    h = emb @ w1 + b1
    h = h * jax.nn.sigmoid(h)
    return h @ w2 + b2


if __name__ == "__main__":
    hidden_size = 32
    frequency_embedding_size = 256  # module default
    batch = 32

    key = jax.random.PRNGKey(0)
    k_t, k_p = jax.random.split(key)
    t = jax.random.uniform(k_t, (batch,), jnp.float32, 0.0, 1000.0)

    w1, b1, w2, b2 = make_params(k_p, hidden_size, frequency_embedding_size)
    freqs = make_freqs(frequency_embedding_size)
    ref = reference(t, freqs, w1, b1, w2, b2)

    # f32 MXU-operand path, small explicit tile to exercise the grid (4 tiles
    # of 8 rows).  Tolerance allows for the EUP approximate reciprocal in SiLU.
    out = timestep_embedder(t, freqs, w1, b1, w2, b2,
                            tile_n=8, mxu_dtype=jnp.float32)
    out = jax.block_until_ready(out)
    assert out.shape == (batch, hidden_size)
    assert jnp.allclose(out, ref, atol=2e-3, rtol=2e-3), "f32 mismatch vs reference"

    # Default path: bf16 MXU operands, auto tile (single tile -> grid of 1).
    out_bf16 = jax.block_until_ready(timestep_embedder(t, freqs, w1, b1, w2, b2))
    assert out_bf16.shape == (batch, hidden_size)
    assert jnp.allclose(out_bf16, ref, atol=5e-2, rtol=5e-2), "bf16 mismatch vs reference"

    print("KERNEL_OK")
</pallas_src>

<mosaic_0001>
module attributes {stable_mosaic.version = 11 : i64} {
  func.func @timestep_embedder_kernel(%arg0: i32, %arg1: memref<8x1xf32, #tpu.memory_space<vmem>>, %arg2: memref<1x128xf32, #tpu.memory_space<vmem>>, %arg3: memref<256x32xf32, #tpu.memory_space<vmem>>, %arg4: memref<1x32xf32, #tpu.memory_space<vmem>>, %arg5: memref<32x32xf32, #tpu.memory_space<vmem>>, %arg6: memref<1x32xf32, #tpu.memory_space<vmem>>, %arg7: memref<8x32xf32, #tpu.memory_space<vmem>>) attributes {dimension_semantics = [#tpu.dimension_semantics<parallel>], iteration_bounds = array<i64: 4>, scalar_prefetch = 0 : i64, scratch_operands = 0 : i64, tpu.core_type = #tpu.core_type<tc>, window_params = [{transform_indices = @transform_0, window_bounds = array<i64: 8, 1>}, {pipeline_mode = #tpu.pipeline_mode<synchronous>, transform_indices = @transform_1, window_bounds = array<i64: 1, 128>}, {pipeline_mode = #tpu.pipeline_mode<synchronous>, transform_indices = @transform_2, window_bounds = array<i64: 256, 32>}, {pipeline_mode = #tpu.pipeline_mode<synchronous>, transform_indices = @transform_3, window_bounds = array<i64: 1, 32>}, {pipeline_mode = #tpu.pipeline_mode<synchronous>, transform_indices = @transform_4, window_bounds = array<i64: 32, 32>}, {pipeline_mode = #tpu.pipeline_mode<synchronous>, transform_indices = @transform_5, window_bounds = array<i64: 1, 32>}, {transform_indices = @transform_6, window_bounds = array<i64: 8, 32>}]} {
    %c0 = arith.constant 0 : index
    %c0_0 = arith.constant 0 : index
    %0 = vector.load %arg1[%c0, %c0_0] : memref<8x1xf32, #tpu.memory_space<vmem>>, vector<8x1xf32>
    %c0_1 = arith.constant 0 : index
    %c0_2 = arith.constant 0 : index
    %1 = vector.load %arg2[%c0_1, %c0_2] : memref<1x128xf32, #tpu.memory_space<vmem>>, vector<1x128xf32>
    %2 = vector.broadcast %0 : vector<8x1xf32> to vector<8x128xf32>
    %3 = vector.broadcast %1 : vector<1x128xf32> to vector<8x128xf32>
    %4 = arith.mulf %2, %3 : vector<8x128xf32>
    %5 = math.cos %4 : vector<8x128xf32>
    %6 = math.sin %4 : vector<8x128xf32>
    %7 = tpu.concatenate %5, %6 in 1 : vector<8x128xf32>, vector<8x128xf32> -> vector<8x256xf32>
    %c0_3 = arith.constant 0 : index
    %c0_4 = arith.constant 0 : index
    %8 = vector.load %arg3[%c0_3, %c0_4] : memref<256x32xf32, #tpu.memory_space<vmem>>, vector<256x32xf32>
    %cst = arith.constant dense<0.000000e+00> : vector<8x32xf32>
    %9 = tpu.matmul %7, %8, %cst {dimension_numbers = #tpu.dot_dimension_numbers<[1], [0], [0], [1], [0, 0, 1, 1], [], []>} : vector<8x256xf32>, vector<256x32xf32>, vector<8x32xf32> -> vector<8x32xf32>
    %c0_5 = arith.constant 0 : index
    %c0_6 = arith.constant 0 : index
    %10 = vector.load %arg4[%c0_5, %c0_6] : memref<1x32xf32, #tpu.memory_space<vmem>>, vector<1x32xf32>
    %11 = vector.broadcast %10 : vector<1x32xf32> to vector<8x32xf32>
    %12 = arith.addf %9, %11 : vector<8x32xf32>
    %cst_7 = arith.constant 0.000000e+00 : f32
    %13 = vector.broadcast %cst_7 : f32 to vector<8x32xf32>
    %14 = arith.subf %13, %12 : vector<8x32xf32>
    %15 = math.exp %14 : vector<8x32xf32>
    %cst_8 = arith.constant 1.000000e+00 : f32
    %16 = vector.broadcast %cst_8 : f32 to vector<8x32xf32>
    %17 = arith.addf %16, %15 : vector<8x32xf32>
    %18 = tpu.reciprocal %17 {approx = true} : vector<8x32xf32> -> vector<8x32xf32>
    %19 = arith.mulf %12, %18 : vector<8x32xf32>
    %c0_9 = arith.constant 0 : index
    %c0_10 = arith.constant 0 : index
    %20 = vector.load %arg5[%c0_9, %c0_10] : memref<32x32xf32, #tpu.memory_space<vmem>>, vector<32x32xf32>
    %cst_11 = arith.constant dense<0.000000e+00> : vector<8x32xf32>
    %21 = tpu.matmul %19, %20, %cst_11 {dimension_numbers = #tpu.dot_dimension_numbers<[1], [0], [0], [1], [0, 0, 1, 1], [], []>} : vector<8x32xf32>, vector<32x32xf32>, vector<8x32xf32> -> vector<8x32xf32>
    %c0_12 = arith.constant 0 : index
    %c0_13 = arith.constant 0 : index
    %22 = vector.load %arg6[%c0_12, %c0_13] : memref<1x32xf32, #tpu.memory_space<vmem>>, vector<1x32xf32>
    %23 = vector.broadcast %22 : vector<1x32xf32> to vector<8x32xf32>
    %24 = arith.addf %21, %23 : vector<8x32xf32>
    %c0_14 = arith.constant 0 : index
    %c0_15 = arith.constant 0 : index
    %25 = vector.load %arg7[%c0_14, %c0_15] : memref<8x32xf32, #tpu.memory_space<vmem>>, vector<8x32xf32>
    tpu.vector_store %arg7[%c0_14, %c0_15], %24 {strides = array<i32>} : memref<8x32xf32, #tpu.memory_space<vmem>>, vector<8x32xf32>,
    return
  }
  func.func @transform_0(%arg0: i32) -> (i32, i32) {
    %c0_i32 = arith.constant 0 : i32
    %c0_i32_0 = arith.constant 0 : i32
    return %arg0, %c0_i32 : i32, i32
  }
  func.func @transform_1(%arg0: i32) -> (i32, i32) {
    %c0_i32 = arith.constant 0 : i32
    %c0_i32_0 = arith.constant 0 : i32
    %c0_i32_1 = arith.constant 0 : i32
    return %c0_i32, %c0_i32_0 : i32, i32
  }
  func.func @transform_2(%arg0: i32) -> (i32, i32) {
    %c0_i32 = arith.constant 0 : i32
    %c0_i32_0 = arith.constant 0 : i32
    %c0_i32_1 = arith.constant 0 : i32
    return %c0_i32, %c0_i32_0 : i32, i32
  }
  func.func @transform_3(%arg0: i32) -> (i32, i32) {
    %c0_i32 = arith.constant 0 : i32
    %c0_i32_0 = arith.constant 0 : i32
    %c0_i32_1 = arith.constant 0 : i32
    return %c0_i32, %c0_i32_0 : i32, i32
  }
  func.func @transform_4(%arg0: i32) -> (i32, i32) {
    %c0_i32 = arith.constant 0 : i32
    %c0_i32_0 = arith.constant 0 : i32
    %c0_i32_1 = arith.constant 0 : i32
    return %c0_i32, %c0_i32_0 : i32, i32
  }
  func.func @transform_5(%arg0: i32) -> (i32, i32) {
    %c0_i32 = arith.constant 0 : i32
    %c0_i32_0 = arith.constant 0 : i32
    %c0_i32_1 = arith.constant 0 : i32
    return %c0_i32, %c0_i32_0 : i32, i32
  }
  func.func @transform_6(%arg0: i32) -> (i32, i32) {
    %c0_i32 = arith.constant 0 : i32
    %c0_i32_0 = arith.constant 0 : i32
    return %arg0, %c0_i32 : i32, i32
  }
}

module attributes {stable_mosaic.version = 11 : i64} {
  func.func @timestep_embedder_kernel(%arg0: i32, %arg1: memref<8x1xf32, #tpu.memory_space<vmem>>, %arg2: memref<1x128xf32, #tpu.memory_space<vmem>>, %arg3: memref<256x32xf32, #tpu.memory_space<vmem>>, %arg4: memref<1x32xf32, #tpu.memory_space<vmem>>, %arg5: memref<32x32xf32, #tpu.memory_space<vmem>>, %arg6: memref<1x32xf32, #tpu.memory_space<vmem>>, %arg7: memref<8x32xf32, #tpu.memory_space<vmem>>) attributes {dimension_semantics = [#tpu.dimension_semantics<parallel>], iteration_bounds = array<i64: 4>, scalar_prefetch = 0 : i64, scratch_operands = 0 : i64, tpu.core_type = #tpu.core_type<tc>, window_params = [{transform_indices = @transform_0, window_bounds = array<i64: 8, 1>}, {pipeline_mode = #tpu.pipeline_mode<synchronous>, transform_indices = @transform_1, window_bounds = array<i64: 1, 128>}, {pipeline_mode = #tpu.pipeline_mode<synchronous>, transform_indices = @transform_2, window_bounds = array<i64: 256, 32>}, {pipeline_mode = #tpu.pipeline_mode<synchronous>, transform_indices = @transform_3, window_bounds = array<i64: 1, 32>}, {pipeline_mode = #tpu.pipeline_mode<synchronous>, transform_indices = @transform_4, window_bounds = array<i64: 32, 32>}, {pipeline_mode = #tpu.pipeline_mode<synchronous>, transform_indices = @transform_5, window_bounds = array<i64: 1, 32>}, {transform_indices = @transform_6, window_bounds = array<i64: 8, 32>}]} {
    %c0 = arith.constant 0 : index
    %c0_0 = arith.constant 0 : index
    %0 = vector.load %arg1[%c0, %c0_0] : memref<8x1xf32, #tpu.memory_space<vmem>>, vector<8x1xf32>
    %c0_1 = arith.constant 0 : index
    %c0_2 = arith.constant 0 : index
    %1 = vector.load %arg2[%c0_1, %c0_2] : memref<1x128xf32, #tpu.memory_space<vmem>>, vector<1x128xf32>
    %2 = vector.broadcast %0 : vector<8x1xf32> to vector<8x128xf32>
    %3 = vector.broadcast %1 : vector<1x128xf32> to vector<8x128xf32>
    %4 = arith.mulf %2, %3 : vector<8x128xf32>
    %5 = math.cos %4 : vector<8x128xf32>
    %6 = math.sin %4 : vector<8x128xf32>
    %7 = tpu.concatenate %5, %6 in 1 : vector<8x128xf32>, vector<8x128xf32> -> vector<8x256xf32>
    %c0_3 = arith.constant 0 : index
    %c0_4 = arith.constant 0 : index
    %8 = vector.load %arg3[%c0_3, %c0_4] : memref<256x32xf32, #tpu.memory_space<vmem>>, vector<256x32xf32>
    %cst = arith.constant dense<0.000000e+00> : vector<8x32xf32>
    %9 = tpu.matmul %7, %8, %cst {dimension_numbers = #tpu.dot_dimension_numbers<[1], [0], [0], [1], [0, 0, 1, 1], [], []>} : vector<8x256xf32>, vector<256x32xf32>, vector<8x32xf32> -> vector<8x32xf32>
    %c0_5 = arith.constant 0 : index
    %c0_6 = arith.constant 0 : index
    %10 = vector.load %arg4[%c0_5, %c0_6] : memref<1x32xf32, #tpu.memory_space<vmem>>, vector<1x32xf32>
    %11 = vector.broadcast %10 : vector<1x32xf32> to vector<8x32xf32>
    %12 = arith.addf %9, %11 : vector<8x32xf32>
    %cst_7 = arith.constant 0.000000e+00 : f32
    %13 = vector.broadcast %cst_7 : f32 to vector<8x32xf32>
    %14 = arith.subf %13, %12 : vector<8x32xf32>
    %15 = math.exp %14 : vector<8x32xf32>
    %cst_8 = arith.constant 1.000000e+00 : f32
    %16 = vector.broadcast %cst_8 : f32 to vector<8x32xf32>
    %17 = arith.addf %16, %15 : vector<8x32xf32>
    %18 = tpu.reciprocal %17 {approx = true} : vector<8x32xf32> -> vector<8x32xf32>
    %19 = arith.mulf %12, %18 : vector<8x32xf32>
    %c0_9 = arith.constant 0 : index
    %c0_10 = arith.constant 0 : index
    %20 = vector.load %arg5[%c0_9, %c0_10] : memref<32x32xf32, #tpu.memory_space<vmem>>, vector<32x32xf32>
    %cst_11 = arith.constant dense<0.000000e+00> : vector<8x32xf32>
    %21 = tpu.matmul %19, %20, %cst_11 {dimension_numbers = #tpu.dot_dimension_numbers<[1], [0], [0], [1], [0, 0, 1, 1], [], []>} : vector<8x32xf32>, vector<32x32xf32>, vector<8x32xf32> -> vector<8x32xf32>
    %c0_12 = arith.constant 0 : index
    %c0_13 = arith.constant 0 : index
    %22 = vector.load %arg6[%c0_12, %c0_13] : memref<1x32xf32, #tpu.memory_space<vmem>>, vector<1x32xf32>
    %23 = vector.broadcast %22 : vector<1x32xf32> to vector<8x32xf32>
    %24 = arith.addf %21, %23 : vector<8x32xf32>
    %c0_14 = arith.constant 0 : index
    %c0_15 = arith.constant 0 : index
    %25 = vector.load %arg7[%c0_14, %c0_15] : memref<8x32xf32, #tpu.memory_space<vmem>>, vector<8x32xf32>
    tpu.vector_store %arg7[%c0_14, %c0_15], %24 {strides = array<i32>} : memref<8x32xf32, #tpu.memory_space<vmem>>, vector<8x32xf32>,
    return
  }
  func.func @transform_0(%arg0: i32) -> (i32, i32) {
    %c0_i32 = arith.constant 0 : i32
    %c0_i32_0 = arith.constant 0 : i32
    return %arg0, %c0_i32 : i32, i32
  }
  func.func @transform_1(%arg0: i32) -> (i32, i32) {
    %c0_i32 = arith.constant 0 : i32
    %c0_i32_0 = arith.constant 0 : i32
    %c0_i32_1 = arith.constant 0 : i32
    return %c0_i32, %c0_i32_0 : i32, i32
  }
  func.func @transform_2(%arg0: i32) -> (i32, i32) {
    %c0_i32 = arith.constant 0 : i32
    %c0_i32_0 = arith.constant 0 : i32
    %c0_i32_1 = arith.constant 0 : i32
    return %c0_i32, %c0_i32_0 : i32, i32
  }
  func.func @transform_3(%arg0: i32) -> (i32, i32) {
    %c0_i32 = arith.constant 0 : i32
    %c0_i32_0 = arith.constant 0 : i32
    %c0_i32_1 = arith.constant 0 : i32
    return %c0_i32, %c0_i32_0 : i32, i32
  }
  func.func @transform_4(%arg0: i32) -> (i32, i32) {
    %c0_i32 = arith.constant 0 : i32
    %c0_i32_0 = arith.constant 0 : i32
    %c0_i32_1 = arith.constant 0 : i32
    return %c0_i32, %c0_i32_0 : i32, i32
  }
  func.func @transform_5(%arg0: i32) -> (i32, i32) {
    %c0_i32 = arith.constant 0 : i32
    %c0_i32_0 = arith.constant 0 : i32
    %c0_i32_1 = arith.constant 0 : i32
    return %c0_i32, %c0_i32_0 : i32, i32
  }
  func.func @transform_6(%arg0: i32) -> (i32, i32) {
    %c0_i32 = arith.constant 0 : i32
    %c0_i32_0 = arith.constant 0 : i32
    return %arg0, %c0_i32 : i32, i32
  }
}

</mosaic_0001>

<bundles_post_ra>
// kernel: tpu_custom_call.1
= control target key start
LH: loop header
LB: loop body
LE: loop exit
PB: predicated region body
PF: predicated region fallthrough
CT: control target
= control target key end

     0   :  { %11 = vsyncpa [#allocation3], 0  ;;  %s1214_s0 = inlined_call_operand.vmem [shape: f32[32,1], index: 0, kind: input, shape index: {}]   ;;  %s1215_s1 = inlined_call_operand.vmem [shape: f32[1,128], index: 1, kind: input, shape index: {}]   ;;  %s1216_s2 = inlined_call_operand.vmem [shape: f32[256,32], index: 2, kind: input, shape index: {}]   ;;  %s1217_s3 = inlined_call_operand.vmem [shape: f32[1,32], index: 3, kind: input, shape index: {}]   ;;  %s1218_s4 = inlined_call_operand.vmem [shape: f32[32,32], index: 4, kind: input, shape index: {}]   ;;  %s1219_s5 = inlined_call_operand.vmem [shape: f32[1,32], index: 5, kind: input, shape index: {}]   ;;  %s1220_s6 = inlined_call_operand.hbm [shape: f32[32,32], index: 6, kind: output, shape index: {}]  }
   0x1   :  { %13 = vsyncpa [#allocation3 + $0x1], 0  ;;  %s983_s21 = smov 0   ;;  %s985_s22 = smov 0  }
   0x2   :  { %s987_s23 = smov 0   ;;  %s989_s24 = smov 0  }
   0x3 LB: > { %s1004_s25 = sadd.s32 4294967295, %s936_s24   ;;  %s742_s26 = sadd.s32 4294967294, %s936_s24   ;;  %s936_s24 = sphi %s989_s24, %s1226_s24   ;;  %s932_s23 = sphi %s987_s23, %s1225_s23   ;;  %s928_s22 = sphi %s985_s22, %s1224_s22   ;;  %s924_s21 = sphi %s983_s21, %s1223_s21  }
   0x4   : > { %s1008_s27 = sadd.s32 1, %s936_s24   ;;  %s157_s28 = sadd.s32 1, %s932_s23 }
   0x5   : > { %s154_s29 = ssub.s32 %s936_s24, %s1008_s27  ;;  %p167_p0 = scmp.ne.s32.totalorder %s932_s23, %s928_s22 }
   0x6   : > { %p155_p1 = scmp.eq.s32.totalorder %s154_s29, 0  ;;  %p168_p2 = scmp.eq.s32.totalorder %s1004_s25, 3 }
   0x7   : > { %p173_p3 = scmp.ne.s32.totalorder %s928_s22, %s924_s21  ;;  %p174_p4 = scmp.eq.s32.totalorder %s742_s26, 3 }
   0x8   : > { %s1019_s30 = scalar_select %p155_p1, %s932_s23, %s157_s28  }
   0x9   : > { %p1021_p5 = por %p168_p2, %p167_p0  ;;  %p1025_p6 = por %p174_p4, %p173_p3 }
   0xa   : > { %p745_p7 = scmp.ge.s32.totalorder %s936_s24, 1  ;;  %p214_p8 = scmp.lt.s32.totalorder %s936_s24, 5 }
   0xc   : > { %p215_p9 = pnand %p745_p7, %p214_p8 }
   0xd   : > { %p243_p10 = scmp.lt.s32.totalorder (!%p215_p9), %s1004_s25, 3  ;;  %s240_s15 = sand.u32 (!%p215_p9), 1, %s928_s22  }
   0xe   : > { %218 = sbr.rel (%p215_p9) target bundleno = 676 (0x2a4), region = 44  ;;  %s746_s16 = sshll.u32 (!%p215_p9), %s240_s15, 3 }
   0xf   : > { %s761_s19 = sshll.u32 (!%p215_p9), %s1004_s25, 7  ;;  %s242_s20 = scalar_lea.vmem (!%p215_p9), [#allocation2], %s746_s16 }
  0x10   : > { %s683_s26 = sshll.u32 (!%p215_p9), %s242_s20, 4  ;;  %s947_s12 = smov (!%p215_p9), [#allocation2]   ;;  %s684_s26 = int_to_ptr.vmem [resolvable:$true] %s683_s26 }
  0x11   : > { %s876_s11 = scalar_lea.vmem (!%p215_p9), %s684_s26, 128 }
  0x12   : > { %p877_p11 = scmp.ne.s32.totalorder (!%p215_p9), %s684_s26, %s876_s11 }
  0x13   : > { %v938_v0 = vmov 0   ;;  %s244_s9 = scalar_select %p243_p10, %s1004_s25, 3  ;;  %v499_v2 = vld [vmem:[%s1216_s2 + $0xf8] sm:$0xff]  ;;  %v498_v4 = vld [vmem:[%s1216_s2 + $0xf0] sm:$0xff]  ;;  %v497_v6 = vld [vmem:[%s1216_s2 + $0xe8] sm:$0xff] }
  0x14   : > { %867 = vset.pattern.permute.xlu0 %v938_v0  ;;  %v483_v3 = vld [vmem:[%s1216_s2 + $0x78] sm:$0xff]  ;;  %764 = vmatprep.subr.mxu0 %v499_v2  ;;  %v482_v5 = vld [vmem:[%s1216_s2 + $0x70] sm:$0xff]  ;;  %v481_v7 = vld [vmem:[%s1216_s2 + $0x68] sm:$0xff]  ;;  %v939_v48 = vmov 2102212464   ;;  %p878_p12 = pnand %p877_p11, %p1021_p5  ;;  %s880_s25 = sshll.u32 %s947_s12, 4  ;;  %s881_s25 = int_to_ptr.vmem [resolvable:$false] %s880_s25 }
  0x15   : > { %s747_s10 = sshll.u32 %s244_s9, 3  ;;  %765 = vmatpush3.msra.mxu0 %v483_v3  ;;  %v496_v8 = vld [vmem:[%s1216_s2 + $0xe0] sm:$0xff]  ;;  %v495_v10 = vld [vmem:[%s1216_s2 + $0xd8] sm:$0xff]  ;;  %v494_v12 = vld [vmem:[%s1216_s2 + $0xd0] sm:$0xff]  ;;  %v940_v50 = vmov 920167782   ;;  %s1179_s9 = scalar_lea.hbm %s1220_s6, %s761_s19 }
  0x16   : > { %s246_s13 = scalar_lea.vmem %s1214_s0, %s747_s10  ;;  %766 = vmatprep.subr.mxu0 %v498_v4  ;;  %v480_v9 = vld [vmem:[%s1216_s2 + $0x60] sm:$0xff]  ;;  %v479_v11 = vld [vmem:[%s1216_s2 + $0x58] sm:$0xff]  ;;  %v478_v13 = vld [vmem:[%s1216_s2 + $0x50] sm:$0xff]  ;;  %v941_v54 = vmov 1326507024   ;;  %s670_s10 = scalar_lea.sflag [#allocation3], %s240_s15 }
  0x17   : > { %v247_v1 = vld [vmem:[%s246_s13] sm:$0xff]  ;;  %767 = vmatpush3.msra.mxu0 %v482_v5  ;;  %v493_v14 = vld [vmem:[%s1216_s2 + $0xc8] sm:$0xff]  ;;  %v491_v18 = vld [vmem:[%s1216_s2 + $0xb8] sm:$0xff]  ;;  %v942_v56 = vmov 683565275   ;;  %p879_p13 = pneg %p878_p12  ;;  %s882_s13 = scalar_lea.vmem %s881_s25, 256 }
  0x18   : > { %251 = vperm.xlu0 %867, %v247_v1   ;;  %768 = vmatprep.subr.mxu0 %v497_v6  ;;  %v477_v15 = vld [vmem:[%s1216_s2 + $0x48] sm:$0xff]  ;;  %v492_v16 = vld [vmem:[%s1216_s2 + $0xc0] sm:$0xff]  ;;  %v475_v19 = vld [vmem:[%s1216_s2 + $0x38] sm:$0xff]  ;;  %v943_v58 = vmov 2475754826   ;;  %p883_p0 = scmp.lt.s32.totalorder %s684_s26, %s881_s25  ;;  %p884_p1 = scmp.lt.s32.totalorder %s882_s13, %s876_s11 }
  0x19   : > { %769 = vmatpush3.msra.mxu0 %v481_v7  ;;  %v476_v17 = vld [vmem:[%s1216_s2 + $0x40] sm:$0xff]  ;;  %v490_v20 = vld [vmem:[%s1216_s2 + $0xb0] sm:$0xff]  ;;  %v489_v22 = vld [vmem:[%s1216_s2 + $0xa8] sm:$0xff]  ;;  %v944_v61 = vmov 2131351028  }
  0x1a   : > { %770 = vmatprep.subr.mxu0 %v496_v8  ;;  %v474_v21 = vld [vmem:[%s1216_s2 + $0x30] sm:$0xff]  ;;  %v473_v23 = vld [vmem:[%s1216_s2 + $0x28] sm:$0xff]  ;;  %v488_v24 = vld [vmem:[%s1216_s2 + $0xa0] sm:$0xff]  ;;  %p885_p2 = por %p884_p1, %p883_p0 }
  0x1b   : > { %771 = vmatpush3.msra.mxu0 %v480_v9  ;;  %v472_v25 = vld [vmem:[%s1216_s2 + $0x20] sm:$0xff]  ;;  %v487_v26 = vld [vmem:[%s1216_s2 + $0x98] sm:$0xff]  ;;  %v486_v28 = vld [vmem:[%s1216_s2 + $0x90] sm:$0xff] }
  0x1c   : > { %772 = vmatprep.subr.mxu0 %v495_v10  ;;  %v471_v27 = vld [vmem:[%s1216_s2 + $0x18] sm:$0xff]  ;;  %v470_v29 = vld [vmem:[%s1216_s2 + $0x10] sm:$0xff]  ;;  %v485_v30 = vld [vmem:[%s1216_s2 + $0x88] sm:$0xff]  ;;  %p886_p3 = pnand %p885_p2, %p879_p13 }
  0x1d   : > { %773 = vmatpush3.msra.mxu0 %v479_v11  ;;  %v469_v31 = vld [vmem:[%s1216_s2 + $0x8] sm:$0xff]  ;;  %v484_v32 = vld [vmem:[%s1216_s2 + $0x80] sm:$0xff] }
  0x1e   : > { %774 = vmatprep.subr.mxu0 %v494_v12  ;;  %v468_v33 = vld [vmem:[%s1216_s2] sm:$0xff] }
  0x1f   : > { %775 = vmatpush3.msra.mxu0 %v478_v13  ;;  %v748_v34 = vld [vmem:[%s1215_s1] ss:$0 sm:$0xff] }
  0x20   : > { %776 = vmatprep.subr.mxu0 %v493_v14 }
  0x21   : > { %777 = vmatpush3.msra.mxu0 %v477_v15 }
  0x22   : > { %778 = vmatprep.subr.mxu0 %v492_v16 }
  0x23   : > { %779 = vmatpush3.msra.mxu0 %v476_v17 }
  0x24   : > { %780 = vmatprep.subr.mxu0 %v491_v18 }
  0x25   : > { %781 = vmatpush3.msra.mxu0 %v475_v19 }
  0x26   : > { %782 = vmatprep.subr.mxu0 %v490_v20 }
  0x27   : > { %783 = vmatpush3.msra.mxu0 %v474_v21 }
  0x28   : > { %784 = vmatprep.subr.mxu0 %v489_v22 }
  0x29   : > { %785 = vmatpush3.msra.mxu0 %v473_v23 }
  0x2a   : > { %786 = vmatprep.subr.mxu0 %v488_v24 }
  0x2b   : > { %787 = vmatpush3.msra.mxu0 %v472_v25 }
  0x2c   : > { %788 = vmatprep.subr.mxu0 %v487_v26 }
  0x2d   : > { %789 = vmatpush3.msra.mxu0 %v471_v27 }
  0x2e   : > { %790 = vmatprep.subr.mxu0 %v486_v28 }
  0x2f   : > { %791 = vmatpush3.msra.mxu0 %v470_v29 }
  0x30   : > { %792 = vmatprep.subr.mxu0 %v485_v30 }
  0x31   : > { %793 = vmatpush3.msra.mxu0 %v469_v31 }
  0x32   : > { %794 = vmatprep.subr.mxu0 %v484_v32 }
  0x33   : > { %795 = vmatpush3.msra.mxu0 %v468_v33 }
  0x93   : > { %v252_v35 = vpop.permute.xlu0 %251 }
  0x94   : > { %v1135_v36 = vmul.f32 %v748_v34, %v252_v35 }
  0x96   : > { %v264_v37 = vand.u32 2139095040, %v1135_v36  ;;  %v261_v38 = vand.u32 2147483647, %v1135_v36  ;;  %vm263_vm7 = vcmp.lt.s32.totalorder %v1135_v36, 0  ;;  %vm353_vm15 = vweird.f32 %v1135_v36 }
  0x98   : > { %v265_v39 = vshrl.u32 %v264_v37, 23  ;;  %v268_v41 = vand.u32 8388607, %v261_v38  ;;  %vm262_vm8 = vcmp.le.f32.partialorder %v261_v38, 0.7853982 }
  0x9a   : > { %v749_v40 = vadd.s32 4294967169, %v265_v39  ;;  %v269_v44 = vor.u32 8388608, %v268_v41 }
  0x9c   : > { %v271_v42 = vadd.s32 1, %v749_v40  ;;  %v309_v52 = vshll.u32 %v269_v44, 8 }
  0x9e   : > { %vm272_vm0 = vcmp.gt.s32.totalorder %v271_v42, 0 }
  0x9f   : > { %v273_v43 = vsel %vm272_vm0, %v271_v42, 0  ;;  %vm946_vm0 = vmmov 0  }
  0xa0   : > { %v275_v45 = vand.u32 31, %v273_v43  ;;  %v274_v46 = vshrl.u32 %v273_v43, 5 }
  0xa2   : > { %v276_v47 = vsub.s32 32, %v275_v45  ;;  %v287_v49 = vshll.u32 %v939_v48, %v275_v45  ;;  %v290_v51 = vshll.u32 %v940_v50, %v275_v45  ;;  %v278_v57 = vshll.u32 %v942_v56, %v275_v45 }
  0xa3   : > { %v281_v60 = vshll.u32 %v943_v58, %v275_v45  ;;  %v284_v63 = vshll.u32 %v944_v61, %v275_v45  ;;  %vm296_vm1 = vcmp.lt.s32.totalorder %v274_v46, 4  ;;  %vm293_vm2 = vcmp.lt.s32.totalorder %v274_v46, 1 }
  0xa4   : > { %v288_v53 = vshrl.u32 %v940_v50, %v276_v47  ;;  %v291_v55 = vshrl.u32 %v941_v54, %v276_v47  ;;  %v279_v59 = vshrl.u32 %v943_v58, %v276_v47  ;;  %v282_v62 = vshrl.u32 %v944_v61, %v276_v47 }
  0xa5   : > { %v285_v0 = vshrl.u32 %v939_v48, %v276_v47  ;;  %v277_v4 = vshrl.u32 %v942_v56, %v276_v47  ;;  %vm294_vm3 = vcmp.lt.s32.totalorder %v274_v46, 2  ;;  %vm295_vm4 = vcmp.lt.s32.totalorder %v274_v46, 3 }
  0xa6   : > { %v289_v1 = vor.u32 %v288_v53, %v287_v49  ;;  %v292_v2 = vor.u32 %v291_v55, %v290_v51  ;;  %v280_v3 = vor.u32 %v279_v59, %v278_v57  ;;  %v283_v5 = vor.u32 %v282_v62, %v281_v60 }
  0xa7   : > { %v286_v6 = vor.u32 %v285_v0, %v284_v63 }
  0xa8   : > { %v302_v7 = vsel %vm296_vm1, %v289_v1, 920167782  ;;  %v306_v8 = vsel %vm296_vm1, %v292_v2, 1326507024  ;;  %v301_v10 = vsel %vm293_vm2, %v280_v3, %v283_v5  ;;  %v297_v13 = vsel %vm293_vm2, %v277_v4, %v280_v3 }
  0xa9   : > { %v298_v9 = vsel %vm296_vm1, %v286_v6, 2102212464  ;;  %v303_v11 = vsel %vm295_vm4, %v286_v6, %v302_v7  ;;  %v305_v12 = vsel %vm293_vm2, %v283_v5, %v286_v6  ;;  %v307_v16 = vsel %vm295_vm4, %v289_v1, %v306_v8  ;;  %v586_v7 = vld [vmem:[%s1218_s4 + $0x18] sm:$0xff]  ;;  %v585_v8 = vld [vmem:[%s1218_s4 + $0x10] sm:$0xff] }
  0xaa   : > { %v299_v14 = vsel %vm295_vm4, %v283_v5, %v298_v9  ;;  %v304_v15 = vsel %vm294_vm3, %v301_v10, %v303_v11  ;;  %v308_v17 = vsel %vm294_vm3, %v305_v12, %v307_v16  ;;  %v945_v6 = vmov 0.0   ;;  %v583_v9 = vld [vmem:[%s1218_s4] sm:$0xff] }
  0xab   : > { %v1141_v18 = vmul.u32.u64.low %v309_v52, %v304_v15  ;;  %v1142_v19 = vmul.u32.u64.high %v309_v52, %v304_v15, %v1141_v18  ;;  %v1144_v20 = vmul.u32.u64.low %v309_v52, %v308_v17  ;;  %v1145_v21 = vmul.u32.u64.high %v309_v52, %v308_v17, %v1144_v20  ;;  %804 = vmatprep.subr.mxu1 %v945_v6  ;;  %812 = vmatprep.mubr.msk.f32.mxu1 %vm946_vm0, %v945_v6  ;;  %v757_v11 = vld [vmem:[%s1217_s3] ss:$0 sm:$0xff] }
  0xac   : > { %v300_v22 = vsel %vm294_vm3, %v297_v13, %v299_v14  ;;  %805 = vmatpush3.msra.mxu1 %v586_v7  ;;  %vm594_vm1 = vcmask 261120  }
  0xad   : > { %v319_v23 = vadd.s32 1, %v1142_v19  ;;  %v316_v24 = vmul.u32 %v309_v52, %v300_v22  ;;  %vm318_vm5 = vc.u32 %v1145_v21, %v1141_v18  ;;  %v317_v37 = vadd.s32 %v1141_v18, %v1145_v21  ;;  %806 = vmatprep.subr.mxu1 %v945_v6  ;;  %v758_v21 = vld [vmem:[%s1219_s5] ss:$0 sm:$0xff] }
  0xae   : > { %807 = vmatpush3.msra.mxu1 %v585_v8 }
  0xaf   : > { %v320_v25 = vsel %vm318_vm5, %v319_v23, %v1142_v19  ;;  %808 = vmatprep.subr.mxu1 %v945_v6 }
  0xb0   : > { %v321_v26 = vadd.s32 %v320_v25, %v316_v24 }
  0xb2   : > { %v322_v27 = vadd.s32 536870912, %v321_v26 }
  0xb4   : > { %v323_v28 = vshrl.u32 %v322_v27, 30 }
  0xb6   : > { %v324_v29 = vshll.u32 %v323_v28, 30  ;;  %v347_v51 = vsub.s32 4, %v323_v28 }
  0xb8   : > { %v325_v30 = vsub.s32 %v321_v26, %v324_v29  ;;  %v348_v54 = vsel %vm263_vm7, %v347_v51, %v323_v28 }
  0xb9   : > { %v350_v55 = vsel %vm262_vm8, 0, %v348_v54 }
  0xba   : > { %v327_v31 = vsub.s32 0, %v325_v30  ;;  %v457_v56 = vadd.s32 3, %v350_v55  ;;  %v354_v58 = vand.u32 3, %v350_v55 }
  0xbc   : > { %v750_v32 = vmin.u32 %v327_v31, %v325_v30  ;;  %v458_v57 = vand.u32 3, %v457_v56  ;;  %vm359_vm10 = vcmp.eq.s32.totalorder %v354_v58, 2  ;;  %vm356_vm12 = vcmp.eq.s32.totalorder %v354_v58, 0 }
  0xbd   : > { %vm355_vm14 = vcmp.lt.s32.totalorder %v354_v58, 2 }
  0xbe   : > { %v329_v33 = vclz %v750_v32  ;;  %vm463_vm9 = vcmp.eq.s32.totalorder %v458_v57, 2  ;;  %vm460_vm11 = vcmp.eq.s32.totalorder %v458_v57, 0  ;;  %vm459_vm13 = vcmp.lt.s32.totalorder %v458_v57, 2 }
  0xc0   : > { %v751_v34 = vadd.s32 4294967294, %v329_v33 }
  0xc2   : > { %vm752_vm6 = vcmp.lt.s32.totalorder %v751_v34, 0 }
  0xc3   : > { %v332_v35 = vsel %vm752_vm6, 0, %v751_v34 }
  0xc4   : > { %v333_v39 = vsub.s32 32, %v332_v35  ;;  %v337_v40 = vsub.s32 4294967266, %v332_v35  ;;  %v334_v41 = vshll.u32 %v325_v30, %v332_v35 }
  0xc6   : > { %v335_v42 = vshrl.u32 %v317_v37, %v333_v39  ;;  %v338_v43 = vadd.s32 127, %v337_v40 }
  0xc8   : > { %v336_v44 = vor.u32 %v335_v42, %v334_v41  ;;  %v339_v45 = vshll.u32 %v338_v43, 23 }
  0xca   : > { %v340_v46 = vor.u32 4788187, %v339_v45  ;;  %v343_v48 = vcvt.s32.f32 %v336_v44 }
  0xcc   : > { %v341_v47 = vand.u32 2147483647, %v340_v46 }
  0xce   : > { %v344_v49 = vmul.f32 %v343_v48, %v341_v47 }
  0xd0   : > { %v345_v50 = vxor.u32 2147483648, %v344_v49 }
  0xd2   : > { %v346_v52 = vsel %vm263_vm7, %v345_v50, %v344_v49 }
  0xd3   : > { %v349_v53 = vsel %vm262_vm8, %v1135_v36, %v346_v52  ;;  %v584_v36 = vld [vmem:[%s1218_s4 + $0x8] sm:$0xff] }
  0xd4   : > { %868 = vcosq.f32 %v349_v53  ;;  %809 = vmatpush3.msra.mxu1 %v584_v36 }
  0xd5   : > { %870 = vsinq.f32 %v349_v53  ;;  %810 = vmatprep.subr.mxu1 %v945_v6 }
  0xd6   : > { %811 = vmatpush3.msra.mxu1 %v583_v9 }
  0xe1   : > { %v869_v59 = vpop.eup %868 }
  0xe2   : > { %v871_v60 = vpop.eup %870  ;;  %v360_v61 = vxor.u32 2147483648, %v869_v59 }
  0xe3   : > { %v357_v62 = vxor.u32 2147483648, %v871_v60 }
  0xe4   : > { %v465_v63 = vsel %vm463_vm9, %v360_v61, %v871_v60  ;;  %v361_v38 = vsel %vm359_vm10, %v360_v61, %v871_v60 }
  0xe5   : > { %v462_v0 = vsel %vm460_vm11, %v869_v59, %v357_v62  ;;  %v358_v1 = vsel %vm356_vm12, %v869_v59, %v357_v62 }
  0xe6   : > { %v466_v2 = vsel %vm459_vm13, %v462_v0, %v465_v63  ;;  %v362_v3 = vsel %vm355_vm14, %v358_v1, %v361_v38 }
  0xe7   : > { %v467_v4 = vsel %vm353_vm15, nan, %v466_v2  ;;  %v363_v5 = vsel %vm353_vm15, nan, %v362_v3 }
  0xe8   : > { %571 = vmatprep.mubr.f32.mxu0 %v467_v4 }
  0xe9   : > { %572 = vmatmul.mubr.f32.vlgmr.msra.gmra.mxu0 %v363_v5 }
 0x1a9   : > { %v796_v10 = vpop.f32.mrf.mxu0 }
 0x1ab   : > { %v797_v12 = vpop.f32.mrf.mxu0 }
 0x1ac   : > { %v798_v13 = vadd.f32 %v797_v12, %v796_v10 }
 0x1ae   : > { %v574_v14 = vadd.f32 %v798_v13, %v757_v11 }
 0x1b0   : > { %v577_v15 = vsub.f32 0.0, %v574_v14 }
 0x1b2   : > { %v578_v16 = vmul.f32 1.442695, %v577_v15 }
 0x1b4   : > { %872 = vpow2.f32 %v578_v16 }
 0x1c1   : > { %v873_v17 = vpop.eup %872 }
 0x1c2   : > { %v580_v18 = vadd.f32 1.0, %v873_v17 }
 0x1c4   : > { %874 = vrcp.f32 %v580_v18 }
 0x1d1   : > { %v875_v19 = vpop.eup %874 }
 0x1d2   : > { %v582_v20 = vmul.f32 %v875_v19, %v574_v14 }
 0x1d4   : > { %813 = vmatmul.mubr.msk.f32.vlgmr.msra.gmra.mxu1 %vm594_vm1, %v582_v20 }
 0x294   : > { %v664_v22 = vpop.f32.mrf.mxu1 }
 0x295   : > { %v665_v23 = vadd.f32 %v758_v21, %v664_v22 }
 0x296   : > { %v814_v24 = vpop.f32.mrf.mxu1 }
 0x297   : > { %668 = vst.msk [vmem:[%s242_s20] sm:$0xff] %vm594_vm1, %v665_v23 }
 0x298   : > { %889 = shalt.err (!%p886_p3)
}
 0x299   : > { %s890_s14 = scalar_lea.hbm %s1179_s9, 128  ;;  %s894_s17 = scalar_lea.hbm %s1220_s6, 512 }
 0x29a   : > { %p891_p4 = scmp.ne.s32.totalorder %s1179_s9, %s890_s14  ;;  %p895_p9 = scmp.lt.s32.totalorder %s1179_s9, %s1220_s6 }
 0x29b   : > { %p896_p10 = scmp.lt.s32.totalorder %s894_s17, %s890_s14 }
 0x29c   : > { %p892_p7 = pnand %p891_p4, %p1021_p5 }
 0x29d   : > { %p897_p11 = por %p896_p10, %p895_p9 }
 0x29e   : > { %p893_p8 = pneg %p892_p7 }
 0x2a0   : > { %p898_p12 = pnand %p897_p11, %p893_p8 }
 0x2a2   : > { %901 = shalt.err (!%p898_p12)
}
 0x2a3   : > { %819 = dma.vmem_to_hbm [thread:$0]  (%p1021_p5), %s684_s26, 128, %s1179_s9, %s670_s10  }
 0x2a4 PF: > { %p825_p13 = scmp.ge.s32.totalorder %s936_s24, 2  ;;  %s695_s20 = sand.u32 1, %s924_s21  }
 0x2a5   : > { %s696_s28 = scalar_lea.sflag [#allocation3], %s695_s20 }
 0x2a6   : > { %p822_p0 = pnand %p825_p13, %p1025_p6 }
 0x2a8   : > { %p823_p1 = pneg %p822_p0 }
 0x2aa   : > { %919 = dma.done.wait (%p823_p1), %s696_s28, 128  }
 0x2ab   : > { %921 = vsyncadd (%p823_p1), %s696_s28, 4294967168  ;;  %p16_p2 = scmp.ge.s32.totalorder %s1008_s27, 6   ;;  %s1223_s21 = smov %s928_s22 }
 0x2ac   : > { %s1224_s22 = smov %s932_s23  ;;  %s1225_s23 = smov %s1019_s30 }
 0x2ad   : > { %s1226_s24 = smov %s1008_s27  ;;  %18 = sbr.rel (!%p16_p2) target bundleno = 3 (0x3), region = 79 }
 0x2b2   :  { %701 = vsyncpa [#allocation3], 1 }
 0x2b3   :  { %703 = vsyncpa [#allocation3 + $0x1], 1 }

// kernel: tpu_custom_call.1
= control target key start
LH: loop header
LB: loop body
LE: loop exit
PB: predicated region body
PF: predicated region fallthrough
CT: control target
= control target key end

     0   :  { %11 = vsyncpa [#allocation3], 0  ;;  %s1214_s0 = inlined_call_operand.vmem [shape: f32[32,1], index: 0, kind: input, shape index: {}]   ;;  %s1215_s1 = inlined_call_operand.vmem [shape: f32[1,128], index: 1, kind: input, shape index: {}]   ;;  %s1216_s2 = inlined_call_operand.vmem [shape: f32[256,32], index: 2, kind: input, shape index: {}]   ;;  %s1217_s3 = inlined_call_operand.vmem [shape: f32[1,32], index: 3, kind: input, shape index: {}]   ;;  %s1218_s4 = inlined_call_operand.vmem [shape: f32[32,32], index: 4, kind: input, shape index: {}]   ;;  %s1219_s5 = inlined_call_operand.vmem [shape: f32[1,32], index: 5, kind: input, shape index: {}]   ;;  %s1220_s6 = inlined_call_operand.hbm [shape: f32[32,32], index: 6, kind: output, shape index: {}]  }
   0x1   :  { %13 = vsyncpa [#allocation3 + $0x1], 0  ;;  %s983_s21 = smov 0   ;;  %s985_s22 = smov 0  }
   0x2   :  { %s987_s23 = smov 0   ;;  %s989_s24 = smov 0  }
   0x3 LB: > { %s1004_s25 = sadd.s32 4294967295, %s936_s24   ;;  %s742_s26 = sadd.s32 4294967294, %s936_s24   ;;  %s936_s24 = sphi %s989_s24, %s1226_s24   ;;  %s932_s23 = sphi %s987_s23, %s1225_s23   ;;  %s928_s22 = sphi %s985_s22, %s1224_s22   ;;  %s924_s21 = sphi %s983_s21, %s1223_s21  }
   0x4   : > { %s1008_s27 = sadd.s32 1, %s936_s24   ;;  %s157_s28 = sadd.s32 1, %s932_s23 }
   0x5   : > { %s154_s29 = ssub.s32 %s936_s24, %s1008_s27  ;;  %p167_p0 = scmp.ne.s32.totalorder %s932_s23, %s928_s22 }
   0x6   : > { %p155_p1 = scmp.eq.s32.totalorder %s154_s29, 0  ;;  %p168_p2 = scmp.eq.s32.totalorder %s1004_s25, 3 }
   0x7   : > { %p173_p3 = scmp.ne.s32.totalorder %s928_s22, %s924_s21  ;;  %p174_p4 = scmp.eq.s32.totalorder %s742_s26, 3 }
   0x8   : > { %s1019_s30 = scalar_select %p155_p1, %s932_s23, %s157_s28  }
   0x9   : > { %p1021_p5 = por %p168_p2, %p167_p0  ;;  %p1025_p6 = por %p174_p4, %p173_p3 }
   0xa   : > { %p745_p7 = scmp.ge.s32.totalorder %s936_s24, 1  ;;  %p214_p8 = scmp.lt.s32.totalorder %s936_s24, 5 }
   0xc   : > { %p215_p9 = pnand %p745_p7, %p214_p8 }
   0xd   : > { %p243_p10 = scmp.lt.s32.totalorder (!%p215_p9), %s1004_s25, 3  ;;  %s240_s15 = sand.u32 (!%p215_p9), 1, %s928_s22  }
   0xe   : > { %218 = sbr.rel (%p215_p9) target bundleno = 676 (0x2a4), region = 44  ;;  %s746_s16 = sshll.u32 (!%p215_p9), %s240_s15, 3 }
   0xf   : > { %s761_s19 = sshll.u32 (!%p215_p9), %s1004_s25, 7  ;;  %s242_s20 = scalar_lea.vmem (!%p215_p9), [#allocation2], %s746_s16 }
  0x10   : > { %s683_s26 = sshll.u32 (!%p215_p9), %s242_s20, 4  ;;  %s947_s12 = smov (!%p215_p9), [#allocation2]   ;;  %s684_s26 = int_to_ptr.vmem [resolvable:$true] %s683_s26 }
  0x11   : > { %s876_s11 = scalar_lea.vmem (!%p215_p9), %s684_s26, 128 }
  0x12   : > { %p877_p11 = scmp.ne.s32.totalorder (!%p215_p9), %s684_s26, %s876_s11 }
  0x13   : > { %v938_v0 = vmov 0   ;;  %s244_s9 = scalar_select %p243_p10, %s1004_s25, 3  ;;  %v499_v2 = vld [vmem:[%s1216_s2 + $0xf8] sm:$0xff]  ;;  %v498_v4 = vld [vmem:[%s1216_s2 + $0xf0] sm:$0xff]  ;;  %v497_v6 = vld [vmem:[%s1216_s2 + $0xe8] sm:$0xff] }
  0x14   : > { %867 = vset.pattern.permute.xlu0 %v938_v0  ;;  %v483_v3 = vld [vmem:[%s1216_s2 + $0x78] sm:$0xff]  ;;  %764 = vmatprep.subr.mxu0 %v499_v2  ;;  %v482_v5 = vld [vmem:[%s1216_s2 + $0x70] sm:$0xff]  ;;  %v481_v7 = vld [vmem:[%s1216_s2 + $0x68] sm:$0xff]  ;;  %v939_v48 = vmov 2102212464   ;;  %p878_p12 = pnand %p877_p11, %p1021_p5  ;;  %s880_s25 = sshll.u32 %s947_s12, 4  ;;  %s881_s25 = int_to_ptr.vmem [resolvable:$false] %s880_s25 }
  0x15   : > { %s747_s10 = sshll.u32 %s244_s9, 3  ;;  %765 = vmatpush3.msra.mxu0 %v483_v3  ;;  %v496_v8 = vld [vmem:[%s1216_s2 + $0xe0] sm:$0xff]  ;;  %v495_v10 = vld [vmem:[%s1216_s2 + $0xd8] sm:$0xff]  ;;  %v494_v12 = vld [vmem:[%s1216_s2 + $0xd0] sm:$0xff]  ;;  %v940_v50 = vmov 920167782   ;;  %s1179_s9 = scalar_lea.hbm %s1220_s6, %s761_s19 }
  0x16   : > { %s246_s13 = scalar_lea.vmem %s1214_s0, %s747_s10  ;;  %766 = vmatprep.subr.mxu0 %v498_v4  ;;  %v480_v9 = vld [vmem:[%s1216_s2 + $0x60] sm:$0xff]  ;;  %v479_v11 = vld [vmem:[%s1216_s2 + $0x58] sm:$0xff]  ;;  %v478_v13 = vld [vmem:[%s1216_s2 + $0x50] sm:$0xff]  ;;  %v941_v54 = vmov 1326507024   ;;  %s670_s10 = scalar_lea.sflag [#allocation3], %s240_s15 }
  0x17   : > { %v247_v1 = vld [vmem:[%s246_s13] sm:$0xff]  ;;  %767 = vmatpush3.msra.mxu0 %v482_v5  ;;  %v493_v14 = vld [vmem:[%s1216_s2 + $0xc8] sm:$0xff]  ;;  %v491_v18 = vld [vmem:[%s1216_s2 + $0xb8] sm:$0xff]  ;;  %v942_v56 = vmov 683565275   ;;  %p879_p13 = pneg %p878_p12  ;;  %s882_s13 = scalar_lea.vmem %s881_s25, 256 }
  0x18   : > { %251 = vperm.xlu0 %867, %v247_v1   ;;  %768 = vmatprep.subr.mxu0 %v497_v6  ;;  %v477_v15 = vld [vmem:[%s1216_s2 + $0x48] sm:$0xff]  ;;  %v492_v16 = vld [vmem:[%s1216_s2 + $0xc0] sm:$0xff]  ;;  %v475_v19 = vld [vmem:[%s1216_s2 + $0x38] sm:$0xff]  ;;  %v943_v58 = vmov 2475754826   ;;  %p883_p0 = scmp.lt.s32.totalorder %s684_s26, %s881_s25  ;;  %p884_p1 = scmp.lt.s32.totalorder %s882_s13, %s876_s11 }
  0x19   : > { %769 = vmatpush3.msra.mxu0 %v481_v7  ;;  %v476_v17 = vld [vmem:[%s1216_s2 + $0x40] sm:$0xff]  ;;  %v490_v20 = vld [vmem:[%s1216_s2 + $0xb0] sm:$0xff]  ;;  %v489_v22 = vld [vmem:[%s1216_s2 + $0xa8] sm:$0xff]  ;;  %v944_v61 = vmov 2131351028  }
  0x1a   : > { %770 = vmatprep.subr.mxu0 %v496_v8  ;;  %v474_v21 = vld [vmem:[%s1216_s2 + $0x30] sm:$0xff]  ;;  %v473_v23 = vld [vmem:[%s1216_s2 + $0x28] sm:$0xff]  ;;  %v488_v24 = vld [vmem:[%s1216_s2 + $0xa0] sm:$0xff]  ;;  %p885_p2 = por %p884_p1, %p883_p0 }
  0x1b   : > { %771 = vmatpush3.msra.mxu0 %v480_v9  ;;  %v472_v25 = vld [vmem:[%s1216_s2 + $0x20] sm:$0xff]  ;;  %v487_v26 = vld [vmem:[%s1216_s2 + $0x98] sm:$0xff]  ;;  %v486_v28 = vld [vmem:[%s1216_s2 + $0x90] sm:$0xff] }
  0x1c   : > { %772 = vmatprep.subr.mxu0 %v495_v10  ;;  %v471_v27 = vld [vmem:[%s1216_s2 + $0x18] sm:$0xff]  ;;  %v470_v29 = vld [vmem:[%s1216_s2 + $0x10] sm:$0xff]  ;;  %v485_v30 = vld [vmem:[%s1216_s2 + $0x88] sm:$0xff]  ;;  %p886_p3 = pnand %p885_p2, %p879_p13 }
  0x1d   : > { %773 = vmatpush3.msra.mxu0 %v479_v11  ;;  %v469_v31 = vld [vmem:[%s1216_s2 + $0x8] sm:$0xff]  ;;  %v484_v32 = vld [vmem:[%s1216_s2 + $0x80] sm:$0xff] }
  0x1e   : > { %774 = vmatprep.subr.mxu0 %v494_v12  ;;  %v468_v33 = vld [vmem:[%s1216_s2] sm:$0xff] }
  0x1f   : > { %775 = vmatpush3.msra.mxu0 %v478_v13  ;;  %v748_v34 = vld [vmem:[%s1215_s1] ss:$0 sm:$0xff] }
  0x20   : > { %776 = vmatprep.subr.mxu0 %v493_v14 }
  0x21   : > { %777 = vmatpush3.msra.mxu0 %v477_v15 }
  0x22   : > { %778 = vmatprep.subr.mxu0 %v492_v16 }
  0x23   : > { %779 = vmatpush3.msra.mxu0 %v476_v17 }
  0x24   : > { %780 = vmatprep.subr.mxu0 %v491_v18 }
  0x25   : > { %781 = vmatpush3.msra.mxu0 %v475_v19 }
  0x26   : > { %782 = vmatprep.subr.mxu0 %v490_v20 }
  0x27   : > { %783 = vmatpush3.msra.mxu0 %v474_v21 }
  0x28   : > { %784 = vmatprep.subr.mxu0 %v489_v22 }
  0x29   : > { %785 = vmatpush3.msra.mxu0 %v473_v23 }
  0x2a   : > { %786 = vmatprep.subr.mxu0 %v488_v24 }
  0x2b   : > { %787 = vmatpush3.msra.mxu0 %v472_v25 }
  0x2c   : > { %788 = vmatprep.subr.mxu0 %v487_v26 }
  0x2d   : > { %789 = vmatpush3.msra.mxu0 %v471_v27 }
  0x2e   : > { %790 = vmatprep.subr.mxu0 %v486_v28 }
  0x2f   : > { %791 = vmatpush3.msra.mxu0 %v470_v29 }
  0x30   : > { %792 = vmatprep.subr.mxu0 %v485_v30 }
  0x31   : > { %793 = vmatpush3.msra.mxu0 %v469_v31 }
  0x32   : > { %794 = vmatprep.subr.mxu0 %v484_v32 }
  0x33   : > { %795 = vmatpush3.msra.mxu0 %v468_v33 }
  0x93   : > { %v252_v35 = vpop.permute.xlu0 %251 }
  0x94   : > { %v1135_v36 = vmul.f32 %v748_v34, %v252_v35 }
  0x96   : > { %v264_v37 = vand.u32 2139095040, %v1135_v36  ;;  %v261_v38 = vand.u32 2147483647, %v1135_v36  ;;  %vm263_vm7 = vcmp.lt.s32.totalorder %v1135_v36, 0  ;;  %vm353_vm15 = vweird.f32 %v1135_v36 }
  0x98   : > { %v265_v39 = vshrl.u32 %v264_v37, 23  ;;  %v268_v41 = vand.u32 8388607, %v261_v38  ;;  %vm262_vm8 = vcmp.le.f32.partialorder %v261_v38, 0.7853982 }
  0x9a   : > { %v749_v40 = vadd.s32 4294967169, %v265_v39  ;;  %v269_v44 = vor.u32 8388608, %v268_v41 }
  0x9c   : > { %v271_v42 = vadd.s32 1, %v749_v40  ;;  %v309_v52 = vshll.u32 %v269_v44, 8 }
  0x9e   : > { %vm272_vm0 = vcmp.gt.s32.totalorder %v271_v42, 0 }
  0x9f   : > { %v273_v43 = vsel %vm272_vm0, %v271_v42, 0  ;;  %vm946_vm0 = vmmov 0  }
  0xa0   : > { %v275_v45 = vand.u32 31, %v273_v43  ;;  %v274_v46 = vshrl.u32 %v273_v43, 5 }
  0xa2   : > { %v276_v47 = vsub.s32 32, %v275_v45  ;;  %v287_v49 = vshll.u32 %v939_v48, %v275_v45  ;;  %v290_v51 = vshll.u32 %v940_v50, %v275_v45  ;;  %v278_v57 = vshll.u32 %v942_v56, %v275_v45 }
  0xa3   : > { %v281_v60 = vshll.u32 %v943_v58, %v275_v45  ;;  %v284_v63 = vshll.u32 %v944_v61, %v275_v45  ;;  %vm296_vm1 = vcmp.lt.s32.totalorder %v274_v46, 4  ;;  %vm293_vm2 = vcmp.lt.s32.totalorder %v274_v46, 1 }
  0xa4   : > { %v288_v53 = vshrl.u32 %v940_v50, %v276_v47  ;;  %v291_v55 = vshrl.u32 %v941_v54, %v276_v47  ;;  %v279_v59 = vshrl.u32 %v943_v58, %v276_v47  ;;  %v282_v62 = vshrl.u32 %v944_v61, %v276_v47 }
  0xa5   : > { %v285_v0 = vshrl.u32 %v939_v48, %v276_v47  ;;  %v277_v4 = vshrl.u32 %v942_v56, %v276_v47  ;;  %vm294_vm3 = vcmp.lt.s32.totalorder %v274_v46, 2  ;;  %vm295_vm4 = vcmp.lt.s32.totalorder %v274_v46, 3 }
  0xa6   : > { %v289_v1 = vor.u32 %v288_v53, %v287_v49  ;;  %v292_v2 = vor.u32 %v291_v55, %v290_v51  ;;  %v280_v3 = vor.u32 %v279_v59, %v278_v57  ;;  %v283_v5 = vor.u32 %v282_v62, %v281_v60 }
  0xa7   : > { %v286_v6 = vor.u32 %v285_v0, %v284_v63 }
  0xa8   : > { %v302_v7 = vsel %vm296_vm1, %v289_v1, 920167782  ;;  %v306_v8 = vsel %vm296_vm1, %v292_v2, 1326507024  ;;  %v301_v10 = vsel %vm293_vm2, %v280_v3, %v283_v5  ;;  %v297_v13 = vsel %vm293_vm2, %v277_v4, %v280_v3 }
  0xa9   : > { %v298_v9 = vsel %vm296_vm1, %v286_v6, 2102212464  ;;  %v303_v11 = vsel %vm295_vm4, %v286_v6, %v302_v7  ;;  %v305_v12 = vsel %vm293_vm2, %v283_v5, %v286_v6  ;;  %v307_v16 = vsel %vm295_vm4, %v289_v1, %v306_v8  ;;  %v586_v7 = vld [vmem:[%s1218_s4 + $0x18] sm:$0xff]  ;;  %v585_v8 = vld [vmem:[%s1218_s4 + $0x10] sm:$0xff] }
  0xaa   : > { %v299_v14 = vsel %vm295_vm4, %v283_v5, %v298_v9  ;;  %v304_v15 = vsel %vm294_vm3, %v301_v10, %v303_v11  ;;  %v308_v17 = vsel %vm294_vm3, %v305_v12, %v307_v16  ;;  %v945_v6 = vmov 0.0   ;;  %v583_v9 = vld [vmem:[%s1218_s4] sm:$0xff] }
  0xab   : > { %v1141_v18 = vmul.u32.u64.low %v309_v52, %v304_v15  ;;  %v1142_v19 = vmul.u32.u64.high %v309_v52, %v304_v15, %v1141_v18  ;;  %v1144_v20 = vmul.u32.u64.low %v309_v52, %v308_v17  ;;  %v1145_v21 = vmul.u32.u64.high %v309_v52, %v308_v17, %v1144_v20  ;;  %804 = vmatprep.subr.mxu1 %v945_v6  ;;  %812 = vmatprep.mubr.msk.f32.mxu1 %vm946_vm0, %v945_v6  ;;  %v757_v11 = vld [vmem:[%s1217_s3] ss:$0 sm:$0xff] }
  0xac   : > { %v300_v22 = vsel %vm294_vm3, %v297_v13, %v299_v14  ;;  %805 = vmatpush3.msra.mxu1 %v586_v7  ;;  %vm594_vm1 = vcmask 261120  }
  0xad   : > { %v319_v23 = vadd.s32 1, %v1142_v19  ;;  %v316_v24 = vmul.u32 %v309_v52, %v300_v22  ;;  %vm318_vm5 = vc.u32 %v1145_v21, %v1141_v18  ;;  %v317_v37 = vadd.s32 %v1141_v18, %v1145_v21  ;;  %806 = vmatprep.subr.mxu1 %v945_v6  ;;  %v758_v21 = vld [vmem:[%s1219_s5] ss:$0 sm:$0xff] }
  0xae   : > { %807 = vmatpush3.msra.mxu1 %v585_v8 }
  0xaf   : > { %v320_v25 = vsel %vm318_vm5, %v319_v23, %v1142_v19  ;;  %808 = vmatprep.subr.mxu1 %v945_v6 }
  0xb0   : > { %v321_v26 = vadd.s32 %v320_v25, %v316_v24 }
  0xb2   : > { %v322_v27 = vadd.s32 536870912, %v321_v26 }
  0xb4   : > { %v323_v28 = vshrl.u32 %v322_v27, 30 }
  0xb6   : > { %v324_v29 = vshll.u32 %v323_v28, 30  ;;  %v347_v51 = vsub.s32 4, %v323_v28 }
  0xb8   : > { %v325_v30 = vsub.s32 %v321_v26, %v324_v29  ;;  %v348_v54 = vsel %vm263_vm7, %v347_v51, %v323_v28 }
  0xb9   : > { %v350_v55 = vsel %vm262_vm8, 0, %v348_v54 }
  0xba   : > { %v327_v31 = vsub.s32 0, %v325_v30  ;;  %v457_v56 = vadd.s32 3, %v350_v55  ;;  %v354_v58 = vand.u32 3, %v350_v55 }
  0xbc   : > { %v750_v32 = vmin.u32 %v327_v31, %v325_v30  ;;  %v458_v57 = vand.u32 3, %v457_v56  ;;  %vm359_vm10 = vcmp.eq.s32.totalorder %v354_v58, 2  ;;  %vm356_vm12 = vcmp.eq.s32.totalorder %v354_v58, 0 }
  0xbd   : > { %vm355_vm14 = vcmp.lt.s32.totalorder %v354_v58, 2 }
  0xbe   : > { %v329_v33 = vclz %v750_v32  ;;  %vm463_vm9 = vcmp.eq.s32.totalorder %v458_v57, 2  ;;  %vm460_vm11 = vcmp.eq.s32.totalorder %v458_v57, 0  ;;  %vm459_vm13 = vcmp.lt.s32.totalorder %v458_v57, 2 }
  0xc0   : > { %v751_v34 = vadd.s32 4294967294, %v329_v33 }
  0xc2   : > { %vm752_vm6 = vcmp.lt.s32.totalorder %v751_v34, 0 }
  0xc3   : > { %v332_v35 = vsel %vm752_vm6, 0, %v751_v34 }
  0xc4   : > { %v333_v39 = vsub.s32 32, %v332_v35  ;;  %v337_v40 = vsub.s32 4294967266, %v332_v35  ;;  %v334_v41 = vshll.u32 %v325_v30, %v332_v35 }
  0xc6   : > { %v335_v42 = vshrl.u32 %v317_v37, %v333_v39  ;;  %v338_v43 = vadd.s32 127, %v337_v40 }
  0xc8   : > { %v336_v44 = vor.u32 %v335_v42, %v334_v41  ;;  %v339_v45 = vshll.u32 %v338_v43, 23 }
  0xca   : > { %v340_v46 = vor.u32 4788187, %v339_v45  ;;  %v343_v48 = vcvt.s32.f32 %v336_v44 }
  0xcc   : > { %v341_v47 = vand.u32 2147483647, %v340_v46 }
  0xce   : > { %v344_v49 = vmul.f32 %v343_v48, %v341_v47 }
  0xd0   : > { %v345_v50 = vxor.u32 2147483648, %v344_v49 }
  0xd2   : > { %v346_v52 = vsel %vm263_vm7, %v345_v50, %v344_v49 }
  0xd3   : > { %v349_v53 = vsel %vm262_vm8, %v1135_v36, %v346_v52  ;;  %v584_v36 = vld [vmem:[%s1218_s4 + $0x8] sm:$0xff] }
  0xd4   : > { %868 = vcosq.f32 %v349_v53  ;;  %809 = vmatpush3.msra.mxu1 %v584_v36 }
  0xd5   : > { %870 = vsinq.f32 %v349_v53  ;;  %810 = vmatprep.subr.mxu1 %v945_v6 }
  0xd6   : > { %811 = vmatpush3.msra.mxu1 %v583_v9 }
  0xe1   : > { %v869_v59 = vpop.eup %868 }
  0xe2   : > { %v871_v60 = vpop.eup %870  ;;  %v360_v61 = vxor.u32 2147483648, %v869_v59 }
  0xe3   : > { %v357_v62 = vxor.u32 2147483648, %v871_v60 }
  0xe4   : > { %v465_v63 = vsel %vm463_vm9, %v360_v61, %v871_v60  ;;  %v361_v38 = vsel %vm359_vm10, %v360_v61, %v871_v60 }
  0xe5   : > { %v462_v0 = vsel %vm460_vm11, %v869_v59, %v357_v62  ;;  %v358_v1 = vsel %vm356_vm12, %v869_v59, %v357_v62 }
  0xe6   : > { %v466_v2 = vsel %vm459_vm13, %v462_v0, %v465_v63  ;;  %v362_v3 = vsel %vm355_vm14, %v358_v1, %v361_v38 }
  0xe7   : > { %v467_v4 = vsel %vm353_vm15, nan, %v466_v2  ;;  %v363_v5 = vsel %vm353_vm15, nan, %v362_v3 }
  0xe8   : > { %571 = vmatprep.mubr.f32.mxu0 %v467_v4 }
  0xe9   : > { %572 = vmatmul.mubr.f32.vlgmr.msra.gmra.mxu0 %v363_v5 }
 0x1a9   : > { %v796_v10 = vpop.f32.mrf.mxu0 }
 0x1ab   : > { %v797_v12 = vpop.f32.mrf.mxu0 }
 0x1ac   : > { %v798_v13 = vadd.f32 %v797_v12, %v796_v10 }
 0x1ae   : > { %v574_v14 = vadd.f32 %v798_v13, %v757_v11 }
 0x1b0   : > { %v577_v15 = vsub.f32 0.0, %v574_v14 }
 0x1b2   : > { %v578_v16 = vmul.f32 1.442695, %v577_v15 }
 0x1b4   : > { %872 = vpow2.f32 %v578_v16 }
 0x1c1   : > { %v873_v17 = vpop.eup %872 }
 0x1c2   : > { %v580_v18 = vadd.f32 1.0, %v873_v17 }
 0x1c4   : > { %874 = vrcp.f32 %v580_v18 }
 0x1d1   : > { %v875_v19 = vpop.eup %874 }
 0x1d2   : > { %v582_v20 = vmul.f32 %v875_v19, %v574_v14 }
 0x1d4   : > { %813 = vmatmul.mubr.msk.f32.vlgmr.msra.gmra.mxu1 %vm594_vm1, %v582_v20 }
 0x294   : > { %v664_v22 = vpop.f32.mrf.mxu1 }
 0x295   : > { %v665_v23 = vadd.f32 %v758_v21, %v664_v22 }
 0x296   : > { %v814_v24 = vpop.f32.mrf.mxu1 }
 0x297   : > { %668 = vst.msk [vmem:[%s242_s20] sm:$0xff] %vm594_vm1, %v665_v23 }
 0x298   : > { %889 = shalt.err (!%p886_p3)
}
 0x299   : > { %s890_s14 = scalar_lea.hbm %s1179_s9, 128  ;;  %s894_s17 = scalar_lea.hbm %s1220_s6, 512 }
 0x29a   : > { %p891_p4 = scmp.ne.s32.totalorder %s1179_s9, %s890_s14  ;;  %p895_p9 = scmp.lt.s32.totalorder %s1179_s9, %s1220_s6 }
 0x29b   : > { %p896_p10 = scmp.lt.s32.totalorder %s894_s17, %s890_s14 }
 0x29c   : > { %p892_p7 = pnand %p891_p4, %p1021_p5 }
 0x29d   : > { %p897_p11 = por %p896_p10, %p895_p9 }
 0x29e   : > { %p893_p8 = pneg %p892_p7 }
 0x2a0   : > { %p898_p12 = pnand %p897_p11, %p893_p8 }
 0x2a2   : > { %901 = shalt.err (!%p898_p12)
}
 0x2a3   : > { %819 = dma.vmem_to_hbm [thread:$0]  (%p1021_p5), %s684_s26, 128, %s1179_s9, %s670_s10  }
 0x2a4 PF: > { %p825_p13 = scmp.ge.s32.totalorder %s936_s24, 2  ;;  %s695_s20 = sand.u32 1, %s924_s21  }
 0x2a5   : > { %s696_s28 = scalar_lea.sflag [#allocation3], %s695_s20 }
 0x2a6   : > { %p822_p0 = pnand %p825_p13, %p1025_p6 }
 0x2a8   : > { %p823_p1 = pneg %p822_p0 }
 0x2aa   : > { %919 = dma.done.wait (%p823_p1), %s696_s28, 128  }
 0x2ab   : > { %921 = vsyncadd (%p823_p1), %s696_s28, 4294967168  ;;  %p16_p2 = scmp.ge.s32.totalorder %s1008_s27, 6   ;;  %s1223_s21 = smov %s928_s22 }
 0x2ac   : > { %s1224_s22 = smov %s932_s23  ;;  %s1225_s23 = smov %s1019_s30 }
 0x2ad   : > { %s1226_s24 = smov %s1008_s27  ;;  %18 = sbr.rel (!%p16_p2) target bundleno = 3 (0x3), region = 79 }
 0x2b2   :  { %701 = vsyncpa [#allocation3], 1 }
 0x2b3   :  { %703 = vsyncpa [#allocation3 + $0x1], 1 }

</bundles_post_ra>
